<compile_context>
chip_gen: v7x
topology: tpu7x:2x2x1
jax: 0.10.0
libtpu: 0.0.40
codegen_flags: <defaults>
</compile_context>

<pallas_src>
import math

import jax
import jax.numpy as jnp
from jax.experimental import pallas as pl
from jax.experimental.pallas import tpu as pltpu

_LANES = 128  # lane-dense output width


def _vmodel_kernel(x_ref, w1_ref, b1_ref, w2_ref, b2_ref, w3_ref, b3_ref, o_ref):
    # fc1 + ReLU (MXU)
    h1 = jnp.dot(x_ref[...], w1_ref[...], preferred_element_type=jnp.float32)
    h1 = jnp.maximum(h1 + b1_ref[...], 0.0)
    # fc2 + ReLU (MXU)
    h2 = jnp.dot(h1, w2_ref[...], preferred_element_type=jnp.float32)
    h2 = jnp.maximum(h2 + b2_ref[...], 0.0)
    # fc3 (out=1): VPU multiply + XLU lane-reduce instead of an N=1 MXU matmul.
    h3 = jnp.sum(h2 * w3_ref[...], axis=-1, keepdims=True) + b3_ref[...]
    # Lane-dense store: broadcast the per-row scalar across 128 lanes so the
    # store is a full (unmasked) vst; the wrapper slices column 0.
    o_ref[...] = jnp.broadcast_to(h3, o_ref.shape).astype(o_ref.dtype)


def vmodel_forward(x, params, *, block_b=256):
    """x: (1, B, inputs) or (B, inputs). Returns (B, 1) float32."""
    # Mirror torch: x.squeeze(0).float()
    if x.ndim == 3 and x.shape[0] == 1:
        x = x[0]
    x = x.astype(jnp.float32)

    w1, b1, w2, b2, w3, b3 = params
    B, inputs = x.shape

    if B <= block_b:
        # Small batch: single invocation, no grid, everything resident in VMEM.
        vmem = pl.BlockSpec(memory_space=pltpu.MemorySpace.VMEM)
        out = pl.pallas_call(
            _vmodel_kernel,
            out_shape=jax.ShapeDtypeStruct((B, _LANES), jnp.float32),
            in_specs=[vmem] * 7,
            out_specs=vmem,
        )(x, w1, b1, w2, b2, w3, b3)
        return out[:, :1]

    # Large batch: tile over B; weights/biases use constant index_maps so they
    # stay VMEM-resident while x/out tiles pipeline underneath the compute.
    num_tiles = pl.cdiv(B, block_b)
    b_padded = num_tiles * block_b
    if b_padded != B:
        x = jnp.pad(x, ((0, b_padded - B), (0, 0)))

    out = pl.pallas_call(
        _vmodel_kernel,
        out_shape=jax.ShapeDtypeStruct((b_padded, _LANES), jnp.float32),
        grid=(num_tiles,),
        in_specs=[
            pl.BlockSpec((block_b, inputs), lambda i: (i, 0)),
            pl.BlockSpec(w1.shape, lambda i: (0, 0)),
            pl.BlockSpec(b1.shape, lambda i: (0, 0)),
            pl.BlockSpec(w2.shape, lambda i: (0, 0)),
            pl.BlockSpec(b2.shape, lambda i: (0, 0)),
            pl.BlockSpec(w3.shape, lambda i: (0, 0)),
            pl.BlockSpec(b3.shape, lambda i: (0, 0)),
        ],
        out_specs=pl.BlockSpec((block_b, _LANES), lambda i: (i, 0)),
        compiler_params=pltpu.CompilerParams(
            dimension_semantics=("parallel",),   # v7x: shard tiles across 2 TCs
            vmem_limit_bytes=64 << 20,           # stay within v7x budget
        ),
    )(x, w1, b1, w2, b2, w3, b3)
    return out[:B, :1]


def init_vmodel_params(key, inputs, fc1_nodes, fc2_nodes):
    """Init mimicking nn.Linear defaults (uniform +/- 1/sqrt(fan_in)).

    fc1/fc2 weights stored transposed (in, out); biases stored (1, out).
    fc3 weight stored as a (1, fc2) row (for the in-kernel lane reduce),
    fc3 bias as (1, 1).
    """
    def linear_t(key, fan_in, fan_out):
        kw, kb = jax.random.split(key)
        bound = 1.0 / math.sqrt(fan_in)
        w = jax.random.uniform(kw, (fan_in, fan_out), jnp.float32, -bound, bound)
        b = jax.random.uniform(kb, (1, fan_out), jnp.float32, -bound, bound)
        return w, b

    k1, k2, k3 = jax.random.split(key, 3)
    w1, b1 = linear_t(k1, inputs, fc1_nodes)
    w2, b2 = linear_t(k2, fc1_nodes, fc2_nodes)
    kw3, kb3 = jax.random.split(k3)
    bound3 = 1.0 / math.sqrt(fc2_nodes)
    w3 = jax.random.uniform(kw3, (1, fc2_nodes), jnp.float32, -bound3, bound3)
    b3 = jax.random.uniform(kb3, (1, 1), jnp.float32, -bound3, bound3)
    return (w1, b1, w2, b2, w3, b3)


def _reference(x, params):
    if x.ndim == 3 and x.shape[0] == 1:
        x = x[0]
    x = x.astype(jnp.float32)
    w1, b1, w2, b2, w3, b3 = params
    h = jnp.maximum(x @ w1 + b1, 0.0)
    h = jnp.maximum(h @ w2 + b2, 0.0)
    return h @ w3.T + b3


if __name__ == "__main__":
    inputs, fc1_nodes, fc2_nodes = 32, 64, 32

    key = jax.random.PRNGKey(0)
    kx, kx2, kp = jax.random.split(key, 3)
    params = init_vmodel_params(kp, inputs, fc1_nodes, fc2_nodes)

    # Small batch (matches the x.squeeze(0) in the PyTorch forward): no-grid path.
    batch = 8
    x_small = jax.random.normal(kx, (1, batch, inputs), dtype=jnp.float32)
    out_small = jax.block_until_ready(vmodel_forward(x_small, params))
    ref_small = _reference(x_small, params)
    assert out_small.shape == (batch, 1), out_small.shape
    assert jnp.allclose(out_small, ref_small, atol=1e-4, rtol=1e-4), "small-batch mismatch"

    # Larger batch: exercises the tiled / weight-resident / parallel path.
    big_batch = 1000  # deliberately not a multiple of the 256-row tile
    x_big = jax.random.normal(kx2, (big_batch, inputs), dtype=jnp.float32)
    out_big = jax.block_until_ready(vmodel_forward(x_big, params))
    ref_big = _reference(x_big, params)
    assert out_big.shape == (big_batch, 1), out_big.shape
    assert jnp.allclose(out_big, ref_big, atol=1e-4, rtol=1e-4), "big-batch mismatch"

    print("KERNEL_OK")
</pallas_src>

<mosaic_0001>
module attributes {stable_mosaic.version = 11 : i64} {
  func.func @_vmodel_kernel(%arg0: memref<8x32xf32, #tpu.memory_space<vmem>>, %arg1: memref<32x64xf32, #tpu.memory_space<vmem>>, %arg2: memref<1x64xf32, #tpu.memory_space<vmem>>, %arg3: memref<64x32xf32, #tpu.memory_space<vmem>>, %arg4: memref<1x32xf32, #tpu.memory_space<vmem>>, %arg5: memref<1x32xf32, #tpu.memory_space<vmem>>, %arg6: memref<1x1xf32, #tpu.memory_space<vmem>>, %arg7: memref<8x128xf32, #tpu.memory_space<vmem>>) attributes {dimension_semantics = [], scalar_prefetch = 0 : i64, scratch_operands = 0 : i64, tpu.core_type = #tpu.core_type<tc>} {
    %c0 = arith.constant 0 : index
    %c0_0 = arith.constant 0 : index
    %0 = vector.load %arg0[%c0, %c0_0] : memref<8x32xf32, #tpu.memory_space<vmem>>, vector<8x32xf32>
    %c0_1 = arith.constant 0 : index
    %c0_2 = arith.constant 0 : index
    %1 = vector.load %arg1[%c0_1, %c0_2] : memref<32x64xf32, #tpu.memory_space<vmem>>, vector<32x64xf32>
    %cst = arith.constant dense<0.000000e+00> : vector<8x64xf32>
    %2 = tpu.matmul %0, %1, %cst {dimension_numbers = #tpu.dot_dimension_numbers<[1], [0], [0], [1], [0, 0, 1, 1], [], []>} : vector<8x32xf32>, vector<32x64xf32>, vector<8x64xf32> -> vector<8x64xf32>
    %c0_3 = arith.constant 0 : index
    %c0_4 = arith.constant 0 : index
    %3 = vector.load %arg2[%c0_3, %c0_4] : memref<1x64xf32, #tpu.memory_space<vmem>>, vector<1x64xf32>
    %4 = vector.broadcast %3 : vector<1x64xf32> to vector<8x64xf32>
    %5 = arith.addf %2, %4 : vector<8x64xf32>
    %cst_5 = arith.constant 0.000000e+00 : f32
    %6 = vector.broadcast %cst_5 : f32 to vector<8x64xf32>
    %7 = arith.maximumf %5, %6 : vector<8x64xf32>
    %c0_6 = arith.constant 0 : index
    %c0_7 = arith.constant 0 : index
    %8 = vector.load %arg3[%c0_6, %c0_7] : memref<64x32xf32, #tpu.memory_space<vmem>>, vector<64x32xf32>
    %cst_8 = arith.constant dense<0.000000e+00> : vector<8x32xf32>
    %9 = tpu.matmul %7, %8, %cst_8 {dimension_numbers = #tpu.dot_dimension_numbers<[1], [0], [0], [1], [0, 0, 1, 1], [], []>} : vector<8x64xf32>, vector<64x32xf32>, vector<8x32xf32> -> vector<8x32xf32>
    %c0_9 = arith.constant 0 : index
    %c0_10 = arith.constant 0 : index
    %10 = vector.load %arg4[%c0_9, %c0_10] : memref<1x32xf32, #tpu.memory_space<vmem>>, vector<1x32xf32>
    %11 = vector.broadcast %10 : vector<1x32xf32> to vector<8x32xf32>
    %12 = arith.addf %9, %11 : vector<8x32xf32>
    %cst_11 = arith.constant 0.000000e+00 : f32
    %13 = vector.broadcast %cst_11 : f32 to vector<8x32xf32>
    %14 = arith.maximumf %12, %13 : vector<8x32xf32>
    %c0_12 = arith.constant 0 : index
    %c0_13 = arith.constant 0 : index
    %15 = vector.load %arg5[%c0_12, %c0_13] : memref<1x32xf32, #tpu.memory_space<vmem>>, vector<1x32xf32>
    %16 = vector.broadcast %15 : vector<1x32xf32> to vector<8x32xf32>
    %17 = arith.mulf %14, %16 : vector<8x32xf32>
    %cst_14 = arith.constant dense<0.000000e+00> : vector<8xf32>
    %18 = vector.multi_reduction <add>, %17, %cst_14 [1] : vector<8x32xf32> to vector<8xf32>
    %19 = vector.shape_cast %18 : vector<8xf32> to vector<8x1xf32>
    %c0_15 = arith.constant 0 : index
    %c0_16 = arith.constant 0 : index
    %20 = vector.load %arg6[%c0_15, %c0_16] : memref<1x1xf32, #tpu.memory_space<vmem>>, vector<1x1xf32>
    %21 = vector.broadcast %20 : vector<1x1xf32> to vector<8x1xf32>
    %22 = arith.addf %19, %21 : vector<8x1xf32>
    %23 = vector.shape_cast %22 : vector<8x1xf32> to vector<8x1xf32>
    %24 = vector.broadcast %23 : vector<8x1xf32> to vector<8x128xf32>
    %c0_17 = arith.constant 0 : index
    %c0_18 = arith.constant 0 : index
    %25 = vector.load %arg7[%c0_17, %c0_18] : memref<8x128xf32, #tpu.memory_space<vmem>>, vector<8x128xf32>
    tpu.vector_store %arg7[%c0_17, %c0_18], %24 {strides = array<i32>} : memref<8x128xf32, #tpu.memory_space<vmem>>, vector<8x128xf32>,
    return
  }
}

</mosaic_0001>

<bundles_post_ra>
// kernel: tpu_custom_call.1
= control target key start
LH: loop header
LB: loop body
LE: loop exit
PB: predicated region body
PF: predicated region fallthrough
CT: control target
= control target key end

     0   :  { %s453_s0 = inlined_call_operand.vmem [shape: f32[8,32], index: 0, kind: input, shape index: {}]   ;;  %s454_s1 = inlined_call_operand.vmem [shape: f32[32,64], index: 1, kind: input, shape index: {}]   ;;  %s455_s2 = inlined_call_operand.vmem [shape: f32[1,64], index: 2, kind: input, shape index: {}]   ;;  %s456_s3 = inlined_call_operand.vmem [shape: f32[64,32], index: 3, kind: input, shape index: {}]   ;;  %s457_s4 = inlined_call_operand.vmem [shape: f32[1,32], index: 4, kind: input, shape index: {}]   ;;  %s458_s5 = inlined_call_operand.vmem [shape: f32[1,32], index: 5, kind: input, shape index: {}]   ;;  %s459_s6 = inlined_call_operand.<no memory space> [shape: f32[1,1], index: 6, kind: input, shape index: {}]   ;;  %s460_s7 = inlined_call_operand.hbm [shape: f32[8,128], index: 7, kind: output, shape index: {}]  }
   0x1   :  { %v12_v0 = vstv %s459_s6 }
   0x2   :  { %13 = vst [vmem:[#allocation2] sm:$0x1] %v12_v0 }
   0x3   :  { %v30_v1 = vld [vmem:[%s454_s1] sm:$0xff]  ;;  %v31_v2 = vld [vmem:[%s454_s1 + $0x8] sm:$0xff]  ;;  %v32_v3 = vld [vmem:[%s454_s1 + $0x10] sm:$0xff]  ;;  %v343_v4 = vmov 0.0|0.0   ;;  %vm344_vm0 = vmmov 0   ;;  %v345_v7 = vmov 0.0  }
   0x4   :  { %295 = vmatprep.subr.bf16.mxu0 %v343_v4  ;;  %v296_v5 = vpack.c.bf16 %v31_v2, %v30_v1  ;;  %v33_v6 = vld [vmem:[%s454_s1 + $0x18] sm:$0xff]  ;;  %273 = vmatprep.mubr.msk.f32.mxu0 %vm344_vm0, %v345_v7  ;;  %v116_v8 = vld [vmem:[%s456_s3] sm:$0xff]  ;;  %v117_v9 = vld [vmem:[%s456_s3 + $0x8] sm:$0xff] }
   0x5   :  { %301 = vmatprep.subr.bf16.mxu1 %v343_v4  ;;  %v118_v10 = vld [vmem:[%s456_s3 + $0x10] sm:$0xff]  ;;  %v119_v11 = vld [vmem:[%s456_s3 + $0x18] sm:$0xff]  ;;  %292 = vmatprep.mubr.msk.f32.mxu1 %vm344_vm0, %v345_v7  ;;  %v299_v12 = vpack.c.bf16 %v33_v6, %v32_v3  ;;  %v302_v13 = vpack.c.bf16 %v117_v9, %v116_v8 }
   0x6   :  { %297 = vmatpush3.bf16.msra.mxu0 %v296_v5 }
   0x7   :  { %298 = vmatprep.subr.bf16.mxu0 %v343_v4 }
   0x8   :  { %14 = vsyncpa [#allocation4], 0  ;;  %303 = vmatpush3.bf16.msra.mxu1 %v302_v13  ;;  %v305_v14 = vpack.c.bf16 %v119_v11, %v118_v10  ;;  %v120_v15 = vld [vmem:[%s456_s3 + $0x20] sm:$0xff]  ;;  %v121_v16 = vld [vmem:[%s456_s3 + $0x28] sm:$0xff]  ;;  %vm41_vm1 = vcmask 261120   ;;  %vm131_vm2 = vcmask 523264  }
   0x9   :  { %304 = vmatprep.subr.bf16.mxu1 %v343_v4  ;;  %v29_v17 = vld [vmem:[%s453_s0] sm:$0xff]  ;;  %v308_v18 = vpack.c.bf16 %v121_v16, %v120_v15  ;;  %v122_v19 = vld [vmem:[%s456_s3 + $0x30] sm:$0xff]  ;;  %v123_v20 = vld [vmem:[%s456_s3 + $0x38] sm:$0xff]  ;;  %v346_v35 = vmov 0  }
   0xa   :  { %300 = vmatpush3.bf16.msra.mxu0 %v299_v12  ;;  %v311_v21 = vpack.c.bf16 %v123_v20, %v122_v19  ;;  %v245_v22 = vld [vmem:[%s455_s2] ss:$0 sm:$0xff]  ;;  %318 = vset.pattern.permute.xlu0 %v346_v35  ;;  %s347_s2 = smov [#allocation3]  }
   0xb   :  { %v247_v27 = vld [vmem:[%s457_s4] ss:$0 sm:$0xff]  ;;  %s237_s4 = sshll.u32 %s347_s2, 4  ;;  %s238_s4 = int_to_ptr.vmem [resolvable:$true] %s237_s4 }
   0xc   :  { %306 = vmatpush3.bf16.msra.mxu1 %v305_v14  ;;  %v249_v31 = vld [vmem:[%s458_s5] ss:$0 sm:$0xff]  ;;  %s319_s8 = scalar_lea.vmem %s238_s4, 128  ;;  %p324_p1 = scmp.lt.s32.totalorder %s238_s4, %s238_s4 }
   0xd   :  { %274 = vmatmul.mubr.msk.f32.vlgmr.msra.gmra.mrb[0].mxu0 %vm41_vm1, %v29_v17  ;;  %307 = vmatprep.subr.bf16.mxu1 %v343_v4  ;;  %v250_v36 = vld [vmem:[#allocation2] ss:$0 sm:$0xff]  ;;  %p320_p0 = scmp.ne.s32.totalorder %s238_s4, %s319_s8  ;;  %p325_p2 = scmp.lt.s32.totalorder %s319_s8, %s319_s8 }
   0xf   :  { %p326_p3 = por %p325_p2, %p324_p1 }
  0x10   :  { %309 = vmatpush3.bf16.msra.mxu1 %v308_v18 }
  0x11   :  { %310 = vmatprep.subr.bf16.mxu1 %v343_v4  ;;  %p327_p4 = pnand %p326_p3, %p320_p0 }
  0x14   :  { %312 = vmatpush3.bf16.msra.mxu1 %v311_v21 }
  0xe0   :  { %v111_v23 = vpop.f32.mrb[0].mxu0 }
  0xe1   :  { %v112_v24 = vadd.f32 %v245_v22, %v111_v23  ;;  %v275_v25 = vpop.f32.mrb[1].mxu0 }
  0xe3   :  { %v115_v26 = vmax.f32 %v112_v24, 0.0 }
  0xe5   :  { %293 = vmatmul.mubr.msk.f32.vlgmr.msra.gmra.mrb[0].mxu1 %vm131_vm2, %v115_v26 }
 0x1b8   :  { %v201_v28 = vpop.f32.mrb[0].mxu1 }
 0x1b9   :  { %v202_v29 = vadd.f32 %v247_v27, %v201_v28  ;;  %v294_v30 = vpop.f32.mrb[1].mxu1 }
 0x1bb   :  { %v205_v32 = vmax.f32 %v202_v29, 0.0 }
 0x1bd   :  { %v213_v33 = vmul.f32 %v249_v31, %v205_v32 }
 0x1bf   :  { %v214_v34 = vsel %vm41_vm1, %v213_v33, 0.0 }
 0x1c0   :  { %215 = vadd.xlane.f32.xlu0 %v214_v34 }
 0x24d   :  { %v216_v37 = vpop.xlane.xlu0 %215 }
 0x24e   :  { %v224_v38 = vadd.f32 %v250_v36, %v216_v37 }
 0x250   :  { %227 = vperm.xlu0 %318, %v224_v38  }
 0x2cf   :  { %v228_v39 = vpop.permute.xlu0 %227 }
 0x2d0   :  { %230 = vst [vmem:[#allocation3] sm:$0xff] %v228_v39 }
 0x2d1   :  { %330 = shalt.err (!%p327_p4)
}
 0x2d2   :  { %s331_s10 = scalar_lea.hbm %s460_s7, 128 }
 0x2d3   :  { %p332_p5 = scmp.ne.s32.totalorder %s460_s7, %s331_s10  ;;  %p335_p6 = scmp.lt.u32.totalorder %s331_s10, %s460_s7 }
 0x2d5   :  { %p337_p7 = pnand %p335_p6, %p332_p5 }
 0x2d7   :  { %340 = shalt.err (!%p337_p7)
}
 0x2d8   :  { %240 = dma.vmem_to_hbm [thread:$0]  %s238_s4, 128, %s460_s7, [#allocation4]  }
 0x2d9   :  { %341 = dma.done.wait [#allocation4], 128  }
 0x2da   :  { %342 = vsyncadd [#allocation4], 4294967168 }
 0x2db   :  { %244 = vsyncpa [#allocation4], 1 }

</bundles_post_ra>
